<compile_context>
chip_gen: v7x
topology: tpu7x:2x2x1
jax: 0.10.0
libtpu: 0.0.40
codegen_flags: <defaults>
</compile_context>

<pallas_src>
import functools

import jax
import jax.numpy as jnp
from jax import lax
from jax.experimental import pallas as pl
from jax.experimental.pallas import tpu as pltpu


HIDDEN = 64
_FMA_K_THRESHOLD = 8   # below this, the layer-1 contraction runs on the VPU


def mlp_kernel(xt_ref, w1_ref, b1_ref, w2_ref, b2_ref, w3_ref, b3_ref, o_ref,
               *, lane_chunk, matmul_dtype):
    input_dim, tile_m = xt_ref.shape
    hidden = w1_ref.shape[0]

    # Weights / biases stay resident in vregs across the whole tile (few vregs).
    w1 = w1_ref[...]                               # [hidden, input_dim] f32
    w2 = w2_ref[...].astype(matmul_dtype)          # [hidden, hidden]
    w3 = w3_ref[...].astype(matmul_dtype)          # [out_dim, hidden]
    b1 = b1_ref[...]                               # [hidden, 1] f32
    b2 = b2_ref[...]                               # [hidden, 1] f32
    b3 = b3_ref[...]                               # [out_dim, 1] f32
    # Hoisted layer-1 accumulator init (broadcast once, reused by every chunk).
    b1_full = jnp.broadcast_to(b1, (hidden, lane_chunk))

    def process(off, size):
        # `size` is a static Python int; `off` is static or lane_chunk-aligned.
        xc = xt_ref[:, pl.ds(off, size)]           # [input_dim, size]

        # ---- Layer 1: Linear(input_dim, 64) + ReLU ------------------------
        if input_dim <= _FMA_K_THRESHOLD:
            # Tiny K (coordinate MLP): broadcast multiply-adds on the VPU
            # instead of an almost-empty MXU pass.
            # NOTE: a stride-0 load (xt_ref[pl.ds(k, hidden, stride=0), ...])
            # could do the sublane replication during the VMEM read; kept as an
            # implicit broadcast here for lowering portability.
            acc = b1_full if size == lane_chunk else jnp.broadcast_to(b1, (hidden, size))
            for k in range(input_dim):                         # static unroll
                acc = acc + w1[:, k:k + 1] * xc[k:k + 1, :]    # [H,1]*[1,M]
            h1 = jnp.maximum(acc, 0.0)
        else:
            h1 = jnp.dot(w1.astype(matmul_dtype), xc.astype(matmul_dtype),
                         preferred_element_type=jnp.float32)
            h1 = jnp.maximum(h1 + b1, 0.0)

        # ---- Layer 2: Linear(64, 64) + ReLU  (MXU: K=64, N=size) ----------
        h2 = jnp.dot(w2, h1.astype(matmul_dtype),
                     preferred_element_type=jnp.float32)
        h2 = jnp.maximum(h2 + b2, 0.0)

        # ---- Layer 3: Linear(64, out_dim), no activation -------------------
        y = jnp.dot(w3, h2.astype(matmul_dtype),
                    preferred_element_type=jnp.float32)
        o_ref[:, pl.ds(off, size)] = (y + b3).astype(o_ref.dtype)

    num_full = tile_m // lane_chunk
    rem = tile_m - num_full * lane_chunk

    def chunk_body(c, carry):
        process(pl.multiple_of(c * lane_chunk, lane_chunk), lane_chunk)
        return carry

    # Fully-unrolled lane-chunk loop: keeps intermediates at [64, lane_chunk]
    # so the register file never spills to VMEM.
    lax.fori_loop(0, num_full, chunk_body, 0, unroll=True)
    if rem:   # static tail (only when tile_m is not a multiple of lane_chunk)
        process(num_full * lane_chunk, rem)


@functools.partial(jax.jit,
                   static_argnames=("tile_m", "lane_chunk", "matmul_dtype"))
def mlp_forward_t(xt, params, *, tile_m=2048, lane_chunk=256,
                  matmul_dtype=jnp.float32):
    """Core entry point (no layout plumbing, no padding passes).

    xt: [input_dim, N] float32 (batch on the lane axis).
    params: PyTorch Linear layout, w*: [out, in], b*: [out, 1].
    Returns y^T: [output_dim, N] float32.
    """
    input_dim, n = xt.shape
    hidden = params["w1"].shape[0]
    output_dim = params["w3"].shape[0]

    if tile_m >= n:
        tile_m = n           # single full-extent block (always a legal block)
    elif tile_m % 128 != 0:
        raise ValueError("tile_m must be a multiple of 128 (lane width)")
    lane_chunk = min(lane_chunk, tile_m)

    # Ragged last tile (n % tile_m != 0) is handled by Pallas boundary masking.
    num_tiles = pl.cdiv(n, tile_m)

    kernel = functools.partial(mlp_kernel, lane_chunk=lane_chunk,
                               matmul_dtype=matmul_dtype)

    in_specs = [
        pl.BlockSpec((input_dim, tile_m), lambda i: (0, i)),    # x^T tile
        pl.BlockSpec((hidden, input_dim), lambda i: (0, 0)),    # w1 (resident)
        pl.BlockSpec((hidden, 1), lambda i: (0, 0)),            # b1
        pl.BlockSpec((hidden, hidden), lambda i: (0, 0)),       # w2
        pl.BlockSpec((hidden, 1), lambda i: (0, 0)),            # b2
        pl.BlockSpec((output_dim, hidden), lambda i: (0, 0)),   # w3
        pl.BlockSpec((output_dim, 1), lambda i: (0, 0)),        # b3
    ]
    out_spec = pl.BlockSpec((output_dim, tile_m), lambda i: (0, i))

    return pl.pallas_call(
        kernel,
        out_shape=jax.ShapeDtypeStruct((output_dim, n), jnp.float32),
        grid_spec=pltpu.PrefetchScalarGridSpec(
            num_scalar_prefetch=0,
            grid=(num_tiles,),
            in_specs=in_specs,
            out_specs=out_spec,
        ),
        compiler_params=pltpu.CompilerParams(
            # Batch axis is embarrassingly parallel -> megacore-shard it.
            dimension_semantics=("parallel",),
        ),
    )(
        xt,
        params["w1"], params["b1"],
        params["w2"], params["b2"],
        params["w3"], params["b3"],
    )


def mlp_forward(x, params, *, tile_m=2048, lane_chunk=256,
                matmul_dtype=jnp.float32):
    """PyTorch-interface wrapper: x [N, input_dim] -> [N, output_dim].
    Callers that can keep data in [dim, N] layout should call mlp_forward_t
    directly and skip the two transposes."""
    yt = mlp_forward_t(x.T, params, tile_m=tile_m, lane_chunk=lane_chunk,
                       matmul_dtype=matmul_dtype)
    return yt.T


def init_params(key, input_dim, output_dim):
    """Deterministic synthetic params in the PyTorch Linear layout [out, in]."""
    k1, k2, k3 = jax.random.split(key, 3)
    w1 = jax.random.normal(k1, (HIDDEN, input_dim), jnp.float32) * (1.0 / jnp.sqrt(input_dim))
    b1 = jnp.zeros((HIDDEN, 1), jnp.float32)
    w2 = jax.random.normal(k2, (HIDDEN, HIDDEN), jnp.float32) * (1.0 / jnp.sqrt(HIDDEN))
    b2 = jnp.zeros((HIDDEN, 1), jnp.float32)
    w3 = jax.random.normal(k3, (output_dim, HIDDEN), jnp.float32) * (1.0 / jnp.sqrt(HIDDEN))
    b3 = jnp.zeros((output_dim, 1), jnp.float32)
    return dict(w1=w1, b1=b1, w2=w2, b2=b2, w3=w3, b3=b3)


def mlp_reference(x, p):
    h1 = jnp.maximum(x @ p["w1"].T + p["b1"].T, 0.0)
    h2 = jnp.maximum(h1 @ p["w2"].T + p["b2"].T, 0.0)
    return h2 @ p["w3"].T + p["b3"].T


if __name__ == "__main__":
    # Coordinate MLP: 2-D coordinates in, 3-channel value out.
    INPUT_DIM = 2
    OUTPUT_DIM = 3
    N = 2000          # not a multiple of tile_m -> exercises the ragged last tile
    TILE_M = 512      # 4 grid steps -> >=2 steps per TensorCore on v7x
    LANE_CHUNK = 256  # [64, 256] f32 intermediates = 16 vregs -> no spills

    key = jax.random.PRNGKey(0)
    kx, kp = jax.random.split(key)
    x = jax.random.uniform(kx, (N, INPUT_DIM), jnp.float32)
    params = init_params(kp, INPUT_DIM, OUTPUT_DIM)

    ref = mlp_reference(x, params)

    # Exact path: f32 MXU operands (matches the PyTorch module up to
    # accumulation order).
    out = mlp_forward(x, params, tile_m=TILE_M, lane_chunk=LANE_CHUNK,
                      matmul_dtype=jnp.float32)
    out = jax.block_until_ready(out)
    assert out.shape == (N, OUTPUT_DIM)
    assert jnp.allclose(out, ref, atol=1e-3, rtol=1e-3), "f32 kernel mismatch vs reference"

    # Fast path for v6e/v7x: bf16 MXU operands with f32 accumulation
    # (~3x fewer MXU passes); looser tolerance reflects bf16 operand rounding.
    out_bf16 = mlp_forward(x, params, tile_m=TILE_M, lane_chunk=LANE_CHUNK,
                           matmul_dtype=jnp.bfloat16)
    out_bf16 = jax.block_until_ready(out_bf16)
    assert out_bf16.shape == (N, OUTPUT_DIM)
    assert jnp.allclose(out_bf16, ref, atol=1e-1, rtol=1e-1), "bf16 kernel mismatch vs reference"

    print("KERNEL_OK")
</pallas_src>

<mosaic_0001>
module attributes {stable_mosaic.version = 11 : i64} {
  func.func @mlp_kernel(%arg0: i32, %arg1: memref<2x512xf32, #tpu.memory_space<vmem>>, %arg2: memref<64x2xf32, #tpu.memory_space<vmem>>, %arg3: memref<64x1xf32, #tpu.memory_space<vmem>>, %arg4: memref<64x64xf32, #tpu.memory_space<vmem>>, %arg5: memref<64x1xf32, #tpu.memory_space<vmem>>, %arg6: memref<3x64xf32, #tpu.memory_space<vmem>>, %arg7: memref<3x1xf32, #tpu.memory_space<vmem>>, %arg8: memref<3x512xf32, #tpu.memory_space<vmem>>) attributes {dimension_semantics = [#tpu.dimension_semantics<parallel>], iteration_bounds = array<i64: 4>, scalar_prefetch = 0 : i64, scratch_operands = 0 : i64, tpu.core_type = #tpu.core_type<tc>, window_params = [{transform_indices = @transform_0, window_bounds = array<i64: 2, 512>}, {pipeline_mode = #tpu.pipeline_mode<synchronous>, transform_indices = @transform_1, window_bounds = array<i64: 64, 2>}, {pipeline_mode = #tpu.pipeline_mode<synchronous>, transform_indices = @transform_2, window_bounds = array<i64: 64, 1>}, {pipeline_mode = #tpu.pipeline_mode<synchronous>, transform_indices = @transform_3, window_bounds = array<i64: 64, 64>}, {pipeline_mode = #tpu.pipeline_mode<synchronous>, transform_indices = @transform_4, window_bounds = array<i64: 64, 1>}, {pipeline_mode = #tpu.pipeline_mode<synchronous>, transform_indices = @transform_5, window_bounds = array<i64: 3, 64>}, {pipeline_mode = #tpu.pipeline_mode<synchronous>, transform_indices = @transform_6, window_bounds = array<i64: 3, 1>}, {transform_indices = @transform_7, window_bounds = array<i64: 3, 512>}]} {
    %c0 = arith.constant 0 : index
    %c0_0 = arith.constant 0 : index
    %0 = vector.load %arg2[%c0, %c0_0] : memref<64x2xf32, #tpu.memory_space<vmem>>, vector<64x2xf32>
    %c0_1 = arith.constant 0 : index
    %c0_2 = arith.constant 0 : index
    %1 = vector.load %arg4[%c0_1, %c0_2] : memref<64x64xf32, #tpu.memory_space<vmem>>, vector<64x64xf32>
    %c0_3 = arith.constant 0 : index
    %c0_4 = arith.constant 0 : index
    %2 = vector.load %arg6[%c0_3, %c0_4] : memref<3x64xf32, #tpu.memory_space<vmem>>, vector<3x64xf32>
    %c0_5 = arith.constant 0 : index
    %c0_6 = arith.constant 0 : index
    %3 = vector.load %arg3[%c0_5, %c0_6] : memref<64x1xf32, #tpu.memory_space<vmem>>, vector<64x1xf32>
    %c0_7 = arith.constant 0 : index
    %c0_8 = arith.constant 0 : index
    %4 = vector.load %arg5[%c0_7, %c0_8] : memref<64x1xf32, #tpu.memory_space<vmem>>, vector<64x1xf32>
    %c0_9 = arith.constant 0 : index
    %c0_10 = arith.constant 0 : index
    %5 = vector.load %arg7[%c0_9, %c0_10] : memref<3x1xf32, #tpu.memory_space<vmem>>, vector<3x1xf32>
    %6 = vector.shape_cast %3 : vector<64x1xf32> to vector<64x1xf32>
    %7 = vector.broadcast %6 : vector<64x1xf32> to vector<64x256xf32>
    %c0_i32 = arith.constant 0 : i32
    %c256_i32 = arith.constant 256 : i32
    %8 = arith.muli %c0_i32, %c256_i32 : i32
    %9 = tpu.assume_multiple %8, 256 : i32
    %c0_11 = arith.constant 0 : index
    %10 = arith.index_cast %9 : i32 to index
    %11 = vector.load %arg1[%c0_11, %10] : memref<2x512xf32, #tpu.memory_space<vmem>>, vector<2x256xf32>
    %12 = vector.extract_strided_slice %0 {offsets = [0, 0], sizes = [64, 1], strides = [1, 1]} : vector<64x2xf32> to vector<64x1xf32>
    %13 = vector.extract_strided_slice %11 {offsets = [0, 0], sizes = [1, 256], strides = [1, 1]} : vector<2x256xf32> to vector<1x256xf32>
    %14 = vector.broadcast %12 : vector<64x1xf32> to vector<64x256xf32>
    %15 = vector.broadcast %13 : vector<1x256xf32> to vector<64x256xf32>
    %16 = arith.mulf %14, %15 : vector<64x256xf32>
    %17 = arith.addf %7, %16 : vector<64x256xf32>
    %18 = vector.extract_strided_slice %0 {offsets = [0, 1], sizes = [64, 1], strides = [1, 1]} : vector<64x2xf32> to vector<64x1xf32>
    %19 = vector.extract_strided_slice %11 {offsets = [1, 0], sizes = [1, 256], strides = [1, 1]} : vector<2x256xf32> to vector<1x256xf32>
    %20 = vector.broadcast %18 : vector<64x1xf32> to vector<64x256xf32>
    %21 = vector.broadcast %19 : vector<1x256xf32> to vector<64x256xf32>
    %22 = arith.mulf %20, %21 : vector<64x256xf32>
    %23 = arith.addf %17, %22 : vector<64x256xf32>
    %cst = arith.constant 0.000000e+00 : f32
    %24 = vector.broadcast %cst : f32 to vector<64x256xf32>
    %25 = arith.maximumf %23, %24 : vector<64x256xf32>
    %cst_12 = arith.constant dense<0.000000e+00> : vector<64x256xf32>
    %26 = tpu.matmul %1, %25, %cst_12 {dimension_numbers = #tpu.dot_dimension_numbers<[1], [0], [0], [1], [0, 0, 1, 1], [], []>} : vector<64x64xf32>, vector<64x256xf32>, vector<64x256xf32> -> vector<64x256xf32>
    %27 = vector.broadcast %4 : vector<64x1xf32> to vector<64x256xf32>
    %28 = arith.addf %26, %27 : vector<64x256xf32>
    %cst_13 = arith.constant 0.000000e+00 : f32
    %29 = vector.broadcast %cst_13 : f32 to vector<64x256xf32>
    %30 = arith.maximumf %28, %29 : vector<64x256xf32>
    %cst_14 = arith.constant dense<0.000000e+00> : vector<3x256xf32>
    %31 = tpu.matmul %2, %30, %cst_14 {dimension_numbers = #tpu.dot_dimension_numbers<[1], [0], [0], [1], [0, 0, 1, 1], [], []>} : vector<3x64xf32>, vector<64x256xf32>, vector<3x256xf32> -> vector<3x256xf32>
    %32 = vector.broadcast %5 : vector<3x1xf32> to vector<3x256xf32>
    %33 = arith.addf %31, %32 : vector<3x256xf32>
    %c0_15 = arith.constant 0 : index
    %34 = arith.index_cast %9 : i32 to index
    %35 = vector.load %arg8[%c0_15, %34] : memref<3x512xf32, #tpu.memory_space<vmem>>, vector<3x256xf32>
    tpu.vector_store %arg8[%c0_15, %34], %33 {strides = array<i32>} : memref<3x512xf32, #tpu.memory_space<vmem>>, vector<3x256xf32>,
    %c1_i32 = arith.constant 1 : i32
    %c256_i32_16 = arith.constant 256 : i32
    %36 = arith.muli %c1_i32, %c256_i32_16 : i32
    %37 = tpu.assume_multiple %36, 256 : i32
    %c0_17 = arith.constant 0 : index
    %38 = arith.index_cast %37 : i32 to index
    %39 = vector.load %arg1[%c0_17, %38] : memref<2x512xf32, #tpu.memory_space<vmem>>, vector<2x256xf32>
    %40 = vector.extract_strided_slice %0 {offsets = [0, 0], sizes = [64, 1], strides = [1, 1]} : vector<64x2xf32> to vector<64x1xf32>
    %41 = vector.extract_strided_slice %39 {offsets = [0, 0], sizes = [1, 256], strides = [1, 1]} : vector<2x256xf32> to vector<1x256xf32>
    %42 = vector.broadcast %40 : vector<64x1xf32> to vector<64x256xf32>
    %43 = vector.broadcast %41 : vector<1x256xf32> to vector<64x256xf32>
    %44 = arith.mulf %42, %43 : vector<64x256xf32>
    %45 = arith.addf %7, %44 : vector<64x256xf32>
    %46 = vector.extract_strided_slice %0 {offsets = [0, 1], sizes = [64, 1], strides = [1, 1]} : vector<64x2xf32> to vector<64x1xf32>
    %47 = vector.extract_strided_slice %39 {offsets = [1, 0], sizes = [1, 256], strides = [1, 1]} : vector<2x256xf32> to vector<1x256xf32>
    %48 = vector.broadcast %46 : vector<64x1xf32> to vector<64x256xf32>
    %49 = vector.broadcast %47 : vector<1x256xf32> to vector<64x256xf32>
    %50 = arith.mulf %48, %49 : vector<64x256xf32>
    %51 = arith.addf %45, %50 : vector<64x256xf32>
    %cst_18 = arith.constant 0.000000e+00 : f32
    %52 = vector.broadcast %cst_18 : f32 to vector<64x256xf32>
    %53 = arith.maximumf %51, %52 : vector<64x256xf32>
    %cst_19 = arith.constant dense<0.000000e+00> : vector<64x256xf32>
    %54 = tpu.matmul %1, %53, %cst_19 {dimension_numbers = #tpu.dot_dimension_numbers<[1], [0], [0], [1], [0, 0, 1, 1], [], []>} : vector<64x64xf32>, vector<64x256xf32>, vector<64x256xf32> -> vector<64x256xf32>
    %55 = vector.broadcast %4 : vector<64x1xf32> to vector<64x256xf32>
    %56 = arith.addf %54, %55 : vector<64x256xf32>
    %cst_20 = arith.constant 0.000000e+00 : f32
    %57 = vector.broadcast %cst_20 : f32 to vector<64x256xf32>
    %58 = arith.maximumf %56, %57 : vector<64x256xf32>
    %cst_21 = arith.constant dense<0.000000e+00> : vector<3x256xf32>
    %59 = tpu.matmul %2, %58, %cst_21 {dimension_numbers = #tpu.dot_dimension_numbers<[1], [0], [0], [1], [0, 0, 1, 1], [], []>} : vector<3x64xf32>, vector<64x256xf32>, vector<3x256xf32> -> vector<3x256xf32>
    %60 = vector.broadcast %5 : vector<3x1xf32> to vector<3x256xf32>
    %61 = arith.addf %59, %60 : vector<3x256xf32>
    %c0_22 = arith.constant 0 : index
    %62 = arith.index_cast %37 : i32 to index
    %63 = vector.load %arg8[%c0_22, %62] : memref<3x512xf32, #tpu.memory_space<vmem>>, vector<3x256xf32>
    tpu.vector_store %arg8[%c0_22, %62], %61 {strides = array<i32>} : memref<3x512xf32, #tpu.memory_space<vmem>>, vector<3x256xf32>,
    %c2_i32 = arith.constant 2 : i32
    return
  }
  func.func @transform_0(%arg0: i32) -> (i32, i32) {
    %c0_i32 = arith.constant 0 : i32
    %c0_i32_0 = arith.constant 0 : i32
    return %c0_i32, %arg0 : i32, i32
  }
  func.func @transform_1(%arg0: i32) -> (i32, i32) {
    %c0_i32 = arith.constant 0 : i32
    %c0_i32_0 = arith.constant 0 : i32
    %c0_i32_1 = arith.constant 0 : i32
    return %c0_i32, %c0_i32_0 : i32, i32
  }
  func.func @transform_2(%arg0: i32) -> (i32, i32) {
    %c0_i32 = arith.constant 0 : i32
    %c0_i32_0 = arith.constant 0 : i32
    %c0_i32_1 = arith.constant 0 : i32
    return %c0_i32, %c0_i32_0 : i32, i32
  }
  func.func @transform_3(%arg0: i32) -> (i32, i32) {
    %c0_i32 = arith.constant 0 : i32
    %c0_i32_0 = arith.constant 0 : i32
    %c0_i32_1 = arith.constant 0 : i32
    return %c0_i32, %c0_i32_0 : i32, i32
  }
  func.func @transform_4(%arg0: i32) -> (i32, i32) {
    %c0_i32 = arith.constant 0 : i32
    %c0_i32_0 = arith.constant 0 : i32
    %c0_i32_1 = arith.constant 0 : i32
    return %c0_i32, %c0_i32_0 : i32, i32
  }
  func.func @transform_5(%arg0: i32) -> (i32, i32) {
    %c0_i32 = arith.constant 0 : i32
    %c0_i32_0 = arith.constant 0 : i32
    %c0_i32_1 = arith.constant 0 : i32
    return %c0_i32, %c0_i32_0 : i32, i32
  }
  func.func @transform_6(%arg0: i32) -> (i32, i32) {
    %c0_i32 = arith.constant 0 : i32
    %c0_i32_0 = arith.constant 0 : i32
    %c0_i32_1 = arith.constant 0 : i32
    return %c0_i32, %c0_i32_0 : i32, i32
  }
  func.func @transform_7(%arg0: i32) -> (i32, i32) {
    %c0_i32 = arith.constant 0 : i32
    %c0_i32_0 = arith.constant 0 : i32
    return %c0_i32, %arg0 : i32, i32
  }
}

</mosaic_0001>

<bundles_post_ra>
// kernel: mlp_forward_t.1
= control target key start
LH: loop header
LB: loop body
LE: loop exit
PB: predicated region body
PF: predicated region fallthrough
CT: control target
= control target key end

     0   :  { %12 = vsyncpa [#allocation3], 0  ;;  %s1994_s0 = inlined_call_operand.vmem [shape: f32[2,2000], index: 0, kind: input, shape index: {}]   ;;  %s1995_s1 = inlined_call_operand.vmem [shape: f32[64,2], index: 1, kind: input, shape index: {}]   ;;  %s1996_s2 = inlined_call_operand.vmem [shape: f32[64,1], index: 2, kind: input, shape index: {}]   ;;  %s1997_s3 = inlined_call_operand.vmem [shape: f32[64,64], index: 3, kind: input, shape index: {}]   ;;  %s1998_s4 = inlined_call_operand.vmem [shape: f32[64,1], index: 4, kind: input, shape index: {}]   ;;  %s1999_s5 = inlined_call_operand.vmem [shape: f32[3,64], index: 5, kind: input, shape index: {}]   ;;  %s2000_s6 = inlined_call_operand.vmem [shape: f32[3,1], index: 6, kind: input, shape index: {}]   ;;  %s2001_s7 = inlined_call_operand.hbm [shape: f32[3,2000], index: 7, kind: output, shape index: {}]  }
   0x1   :  { %14 = vsyncpa [#allocation3 + $0x1], 0  ;;  %s1480_s24 = smov 0   ;;  %s1482_s25 = smov 0  }
   0x2   :  { %s1484_s26 = smov 0   ;;  %s1486_s27 = smov 0  }
   0x3 LB: > { %s1501_s28 = sadd.s32 4294967295, %s1434_s27   ;;  %s1221_s29 = sadd.s32 4294967294, %s1434_s27   ;;  %s1434_s27 = sphi %s1486_s27, %s2007_s27   ;;  %s1430_s26 = sphi %s1484_s26, %s2006_s26   ;;  %s1426_s25 = sphi %s1482_s25, %s2005_s25   ;;  %s1422_s24 = sphi %s1480_s24, %s2004_s24  }
   0x4   : > { %s1505_s30 = sadd.s32 1, %s1434_s27   ;;  %s179_s8 = sadd.s32 1, %s1430_s26 }
   0x5   : > { %s176_s9 = ssub.s32 %s1434_s27, %s1505_s30  ;;  %p189_p0 = scmp.ne.s32.totalorder %s1430_s26, %s1426_s25 }
   0x6   : > { %p177_p1 = scmp.eq.s32.totalorder %s176_s9, 0  ;;  %p190_p2 = scmp.eq.s32.totalorder %s1501_s28, 3 }
   0x7   : > { %p195_p3 = scmp.ne.s32.totalorder %s1426_s25, %s1422_s24  ;;  %p196_p4 = scmp.eq.s32.totalorder %s1221_s29, 3 }
   0x8   : > { %s1516_s10 = scalar_select %p177_p1, %s1430_s26, %s179_s8  }
   0x9   : > { %p1518_p5 = por %p190_p2, %p189_p0  ;;  %p1522_p6 = por %p196_p4, %p195_p3 }
   0xa   : > { %p1224_p7 = scmp.ge.s32.totalorder %s1434_s27, 1  ;;  %p241_p8 = scmp.lt.s32.totalorder %s1434_s27, 5 }
   0xc   : > { %p242_p9 = pnand %p1224_p7, %p241_p8 }
   0xd   : > { %v297_v0 = vld [vmem:[%s1996_s2] sm:$0xff] (!%p242_p9)  ;;  %v396_v2 = vlaneseq (!%p242_p9)  ;;  %s1226_s17 = sshll.u32 (!%p242_p9), %s1501_s28, 2  ;;  %v1436_v3 = vmov (!%p242_p9), 0   ;;  %v298_v5 = vld [vmem:[%s1996_s2 + $0x8] sm:$0xff] (!%p242_p9)  ;;  %v283_v11 = vld [vmem:[%s1995_s1 + $0x18] sm:$0xff] (!%p242_p9)  ;;  %v1437_v17 = vmov (!%p242_p9), 1  }
   0xe   : > { %245 = sbr.rel (%p242_p9) target bundleno = 967 (0x3c7), region = 48  ;;  %v280_v1 = vld [vmem:[%s1995_s1] sm:$0xff] (!%p242_p9)  ;;  %1361 = vset.pattern.permute.xlu1 (!%p242_p9), %v1436_v3  ;;  %1360 = vset.pattern.permute.xlu0 (!%p242_p9), %v1436_v3  ;;  %p274_p10 = scmp.lt.s32.totalorder (!%p242_p9), %s1226_s17, 15  ;;  %v281_v6 = vld [vmem:[%s1995_s1 + $0x8] sm:$0xff] (!%p242_p9)  ;;  %v282_v23 = vld [vmem:[%s1995_s1 + $0x10] sm:$0xff] (!%p242_p9)  ;;  %v1438_v33 = vmov (!%p242_p9), 0.0  }
   0xf   : > { %316 = vperm.xlu1 (!%p242_p9), %1361, %v297_v0   ;;  %357 = vperm.xlu0 (!%p242_p9), %1360, %v280_v1   ;;  %v1537_v4 = vshrl.u32 (!%p242_p9), %v396_v2, 7  ;;  %v285_v19 = vld [vmem:[%s1995_s1 + $0x28] sm:$0xff] (!%p242_p9)  ;;  %v287_v24 = vld [vmem:[%s1995_s1 + $0x38] sm:$0xff] (!%p242_p9)  ;;  %v299_v25 = vld [vmem:[%s1996_s2 + $0x10] sm:$0xff] (!%p242_p9)  ;;  %vm584_vm0 = vcmask (!%p242_p9), 523264   ;;  %s270_s18 = sand.u32 (!%p242_p9), 1, %s1426_s25  }
  0x10   : > { %v300_v26 = vld [vmem:[%s1996_s2 + $0x18] sm:$0xff] (!%p242_p9)  ;;  %v284_v27 = vld [vmem:[%s1995_s1 + $0x20] sm:$0xff] (!%p242_p9)  ;;  %v286_v28 = vld [vmem:[%s1995_s1 + $0x30] sm:$0xff] (!%p242_p9)  ;;  %673 = vmatprep.mubr.f32.mxu0 (!%p242_p9), %v1438_v33  ;;  %810 = vmatprep.mubr.f32.mxu1 (!%p242_p9), %v1438_v33  ;;  %s1225_s19 = sshll.u32 (!%p242_p9), %s270_s18, 4  ;;  %s1253_s21 = sshll.u32 (!%p242_p9), %s1501_s28, 8 }
  0x11   : > { %v1546_v7 = vsub.s32 (!%p242_p9), 0, %v1537_v4  ;;  %v402_v8 = vsub.s32 (!%p242_p9), 2, %v1537_v4  ;;  %v1550_v9 = vsub.s32 (!%p242_p9), 1, %v1537_v4  ;;  %v484_v10 = vsub.s32 (!%p242_p9), 3, %v1537_v4  ;;  %v301_v29 = vld [vmem:[%s1996_s2 + $0x20] sm:$0xff] (!%p242_p9)  ;;  %v302_v30 = vld [vmem:[%s1996_s2 + $0x28] sm:$0xff] (!%p242_p9)  ;;  %s1949_s9 = scalar_lea.hbm (!%p242_p9), %s2001_s7, %s1253_s21 }
  0x12   : > { %v303_v31 = vld [vmem:[%s1996_s2 + $0x30] sm:$0xff] (!%p242_p9)  ;;  %v304_v32 = vld [vmem:[%s1996_s2 + $0x38] sm:$0xff] (!%p242_p9)  ;;  %v305_v34 = vld [vmem:[%s1998_s4] sm:$0xff] (!%p242_p9)  ;;  %s1921_s20 = scalar_lea.vmem (!%p242_p9), [#allocation2], %s1225_s19  ;;  %s1148_s13 = scalar_lea.sflag (!%p242_p9), [#allocation3], %s270_s18 }
  0x13   : > { %321 = vperm.xlu1 (!%p242_p9), %1361, %v298_v5   ;;  %362 = vperm.xlu0 (!%p242_p9), %1360, %v281_v6   ;;  %v306_v35 = vld [vmem:[%s1998_s4 + $0x8] sm:$0xff] (!%p242_p9)  ;;  %v307_v36 = vld [vmem:[%s1998_s4 + $0x10] sm:$0xff] (!%p242_p9)  ;;  %v309_v37 = vld [vmem:[%s1998_s4 + $0x20] sm:$0xff] (!%p242_p9)  ;;  %s1439_s28 = smov (!%p242_p9), [#allocation2]  }
  0x14   : > { %v308_v38 = vld [vmem:[%s1998_s4 + $0x18] sm:$0xff] (!%p242_p9)  ;;  %v311_v39 = vld [vmem:[%s1998_s4 + $0x30] sm:$0xff] (!%p242_p9)  ;;  %v310_v40 = vld [vmem:[%s1998_s4 + $0x28] sm:$0xff] (!%p242_p9) }
  0x15   : > { %s2009_s17 = smov (!%p274_p10, %s1226_s17), 15  ;;  %v313_v41 = vld [vmem:[%s2000_s6] sm:$0x7]  ;;  %v312_v42 = vld [vmem:[%s1998_s4 + $0x38] sm:$0xff] }
  0x16   : > { %s1227_s22 = sshll.u32 %s2009_s17, 1 }
  0x17   : > { %s1556_s8 = scalar_lea.vmem %s1994_s0, %s1227_s22  ;;  %1362 = vset.pattern.permute.xlu1 %v1437_v17  ;;  %372 = vperm.xlu0 %1360, %v283_v11   ;;  %s1162_s22 = sshll.u32 %s1921_s20, 4  ;;  %s1951_s22 = int_to_ptr.vmem [resolvable:$true] %s1162_s22 }
  0x18   : > { %v1237_v12 = vld [vmem:[%s1556_s8 + $0x4] sm:$0xf]  ;;  %451 = vperm.xlu1 %1362, %v281_v6   ;;  %v354_v51 = vld [vmem:[%s1556_s8] sm:$0xf]  ;;  %s1372_s14 = scalar_lea.vmem %s1951_s22, 256  ;;  %s1376_s8 = sshll.u32 %s1439_s28, 4  ;;  %s1377_s8 = int_to_ptr.vmem [resolvable:$false] %s1376_s8 }
  0x19   : > { %v828_v13 = vrot.slane %v1237_v12, %v1546_v7  ;;  %v832_v14 = vrot.slane %v1237_v12, %v402_v8  ;;  %v878_v15 = vrot.slane %v1237_v12, %v1550_v9  ;;  %v882_v16 = vrot.slane %v1237_v12, %v484_v10  ;;  %p1373_p11 = scmp.ne.s32.totalorder %s1951_s22, %s1372_s14  ;;  %s1378_s15 = scalar_lea.vmem %s1377_s8, 512 }
  0x1a   : > { %v399_v56 = vrot.slane %v354_v51, %v1546_v7  ;;  %v403_v57 = vrot.slane %v354_v51, %v402_v8  ;;  %v481_v60 = vrot.slane %v354_v51, %v1550_v9  ;;  %v485_v63 = vrot.slane %v354_v51, %v484_v10  ;;  %p1379_p0 = scmp.lt.s32.totalorder %s1951_s22, %s1377_s8  ;;  %p1380_p1 = scmp.lt.s32.totalorder %s1378_s15, %s1372_s14 }
  0x1b   : > { %v1569_v18 = vrot.slane %v828_v13, %v1546_v7  ;;  %v1575_v20 = vrot.slane %v832_v14, %v1546_v7  ;;  %v1578_v21 = vrot.slane %v878_v15, %v1550_v9  ;;  %v1581_v22 = vrot.slane %v882_v16, %v1550_v9  ;;  %382 = vperm.xlu0 %1360, %v285_v19   ;;  %p1374_p12 = pnand %p1373_p11, %p1518_p5 }
  0x1c   : > { %1363 = vset.pattern.permute.xlu1 %v1436_v3  ;;  %v1663_v2 = vrot.slane %v399_v56, %v1546_v7  ;;  %p1381_p2 = por %p1380_p1, %p1379_p0 }
  0x1d   : > { %367 = vperm.xlu1 %1363, %v282_v23   ;;  %p1375_p13 = pneg %p1374_p12 }
  0x1f   : > { %392 = vperm.xlu0 %1360, %v287_v24   ;;  %p1382_p3 = pnand %p1381_p2, %p1375_p13 }
  0x21   : > { %326 = vperm.xlu1 %1363, %v299_v25  }
  0x23   : > { %1368 = vset.pattern.permute.xlu0 %v1437_v17 }
  0x24   : > { %447 = vperm.xlu0 %1368, %v280_v1  }
  0x25   : > { %331 = vperm.xlu1 %1363, %v300_v26  }
  0x28   : > { %455 = vperm.xlu0 %1368, %v282_v23  }
  0x29   : > { %1364 = vset.pattern.permute.xlu1 %v1437_v17 }
  0x2a   : > { %459 = vperm.xlu1 %1364, %v283_v11   ;;  %v1675_v11 = vrot.slane %v481_v60, %v1550_v9 }
  0x2c   : > { %463 = vperm.xlu0 %1368, %v284_v27  }
  0x2e   : > { %1365 = vset.pattern.permute.xlu1 %v1436_v3 }
  0x2f   : > { %377 = vperm.xlu1 %1365, %v284_v27  }
  0x30   : > { %471 = vperm.xlu0 %1368, %v286_v28  }
  0x33   : > { %336 = vperm.xlu1 %1365, %v301_v29  }
  0x34   : > { %1371 = vset.pattern.permute.xlu0 %v1436_v3 }
  0x35   : > { %551 = vperm.xlu0 %1371, %v306_v35  }
  0x37   : > { %341 = vperm.xlu1 %1365, %v302_v30  }
  0x39   : > { %566 = vperm.xlu0 %1371, %v309_v37  }
  0x3b   : > { %1366 = vset.pattern.permute.xlu1 %v1437_v17 }
  0x3c   : > { %467 = vperm.xlu1 %1366, %v285_v19  }
  0x3d   : > { %576 = vperm.xlu0 %1371, %v311_v39  }
  0x40   : > { %1367 = vset.pattern.permute.xlu1 %v1436_v3 }
  0x41   : > { %387 = vperm.xlu1 %1367, %v286_v28   ;;  %740 = vperm.xlu0 %1371, %v313_v41  }
  0x45   : > { %346 = vperm.xlu1 %1367, %v303_v31  }
  0x49   : > { %351 = vperm.xlu1 %1367, %v304_v32  }
  0x4d   : > { %1369 = vset.pattern.permute.xlu1 %v1437_v17 }
  0x4e   : > { %475 = vperm.xlu1 %1369, %v287_v24  }
  0x52   : > { %1370 = vset.pattern.permute.xlu1 %v1436_v3  ;;  %v1666_v3 = vrot.slane %v403_v57, %v1546_v7  ;;  %v1686_v7 = vrot.slane %v485_v63, %v1550_v9 }
  0x53   : > { %546 = vperm.xlu1 %1370, %v305_v34  }
  0x57   : > { %556 = vperm.xlu1 %1370, %v307_v36  }
  0x5b   : > { %561 = vperm.xlu1 %1370, %v308_v38  }
  0x5f   : > { %571 = vperm.xlu1 %1370, %v310_v40  }
  0x63   : > { %581 = vperm.xlu1 %1370, %v312_v42  }
  0x8e   : > { %v317_v43 = vpop.permute.xlu1 %316  ;;  %v358_v44 = vpop.permute.xlu0 %357 }
  0x8f   : > { %v843_v45 = vmul.f32 %v1569_v18, %v358_v44  ;;  %v844_v46 = vmul.f32 %v1575_v20, %v358_v44  ;;  %v414_v17 = vmul.f32 %v1663_v2, %v358_v44  ;;  %v415_v19 = vmul.f32 %v1666_v3, %v358_v44 }
  0x91   : > { %v859_v47 = vadd.f32 %v843_v45, %v317_v43  ;;  %v860_v48 = vadd.f32 %v844_v46, %v317_v43  ;;  %v431_v32 = vadd.f32 %v415_v19, %v317_v43  ;;  %v430_v37 = vadd.f32 %v414_v17, %v317_v43 }
  0x92   : > { %v322_v49 = vpop.permute.xlu1 %321  ;;  %v363_v50 = vpop.permute.xlu0 %362 }
  0x93   : > { %v845_v52 = vmul.f32 %v1569_v18, %v363_v50  ;;  %v846_v53 = vmul.f32 %v1575_v20, %v363_v50  ;;  %v416_v13 = vmul.f32 %v1663_v2, %v363_v50  ;;  %v417_v14 = vmul.f32 %v1666_v3, %v363_v50 }
  0x95   : > { %v861_v54 = vadd.f32 %v845_v52, %v322_v49  ;;  %v862_v55 = vadd.f32 %v846_v53, %v322_v49  ;;  %v433_v30 = vadd.f32 %v417_v14, %v322_v49  ;;  %v432_v31 = vadd.f32 %v416_v13, %v322_v49 }
  0x96   : > { %v373_v58 = vpop.permute.xlu0 %372 }
  0x97   : > { %v452_v59 = vpop.permute.xlu1 %451  ;;  %v849_v61 = vmul.f32 %v1569_v18, %v373_v58  ;;  %v850_v62 = vmul.f32 %v1575_v20, %v373_v58  ;;  %v421_v34 = vmul.f32 %v1666_v3, %v373_v58  ;;  %v420_v45 = vmul.f32 %v1663_v2, %v373_v58 }
  0x98   : > { %v895_v0 = vmul.f32 %v1578_v21, %v452_v59  ;;  %v896_v1 = vmul.f32 %v1581_v22, %v452_v59  ;;  %v498_v24 = vmul.f32 %v1675_v11, %v452_v59  ;;  %v499_v26 = vmul.f32 %v1686_v7, %v452_v59 }
  0x9a   : > { %v1668_v5 = vadd.f32 %v895_v0, %v861_v54  ;;  %v1670_v6 = vpop.permute.xlu0 %382  ;;  %v1672_v8 = vadd.f32 %v896_v1, %v862_v55  ;;  %v515_v36 = vadd.f32 %v499_v26, %v433_v30  ;;  %v514_v38 = vadd.f32 %v498_v24, %v432_v31 }
  0x9b   : > { %v1679_v4 = vmul.f32 %v1569_v18, %v1670_v6  ;;  %v1683_v10 = vmul.f32 %v1575_v20, %v1670_v6 }
  0x9c   : > { %v368_v12 = vpop.permute.xlu1 %367  ;;  %v531_v57 = vmax.f32 %v515_v36, 0.0  ;;  %v530_v59 = vmax.f32 %v514_v38, 0.0 }
  0x9d   : > { %v847_v15 = vmul.f32 %v1569_v18, %v368_v12  ;;  %v848_v16 = vmul.f32 %v1575_v20, %v368_v12  ;;  %v419_v46 = vmul.f32 %v1666_v3, %v368_v12  ;;  %v418_v54 = vmul.f32 %v1663_v2, %v368_v12 }
  0x9e   : > { %v1694_v23 = vpop.permute.xlu0 %392 }
  0x9f   : > { %v1699_v9 = vmul.f32 %v1569_v18, %v1694_v23  ;;  %v1703_v25 = vmul.f32 %v1575_v20, %v1694_v23 }
  0xa0   : > { %v327_v27 = vpop.permute.xlu1 %326 }
  0xa1   : > { %v863_v28 = vadd.f32 %v847_v15, %v327_v27  ;;  %v1706_v29 = vadd.f32 %v848_v16, %v327_v27  ;;  %v435_v55 = vadd.f32 %v419_v46, %v327_v27  ;;  %v434_v30 = vadd.f32 %v418_v54, %v327_v27 }
  0xa3   : > { %v448_v35 = vpop.permute.xlu0 %447 }
  0xa4   : > { %v496_v39 = vmul.f32 %v1675_v11, %v448_v35  ;;  %v893_v40 = vmul.f32 %v1578_v21, %v448_v35  ;;  %v894_v41 = vmul.f32 %v1581_v22, %v448_v35  ;;  %v332_v42 = vpop.permute.xlu1 %331  ;;  %v497_v44 = vmul.f32 %v1686_v7, %v448_v35 }
  0xa5   : > { %v865_v49 = vadd.f32 %v849_v61, %v332_v42  ;;  %v866_v50 = vadd.f32 %v850_v62, %v332_v42  ;;  %v437_v60 = vadd.f32 %v421_v34, %v332_v42  ;;  %v436_v31 = vadd.f32 %v420_v45, %v332_v42 }
  0xa6   : > { %v909_v51 = vadd.f32 %v893_v40, %v859_v47  ;;  %v513_v52 = vadd.f32 %v497_v44, %v431_v32  ;;  %v512_v53 = vadd.f32 %v496_v39, %v430_v37  ;;  %v910_v43 = vadd.f32 %v894_v41, %v860_v48 }
  0xa7   : > { %v456_v56 = vpop.permute.xlu0 %455  ;;  %v928_v34 = vmax.f32 %v1672_v8, 0.0  ;;  %v927_v44 = vmax.f32 %v1668_v5, 0.0 }
  0xa8   : > { %v500_v63 = vmul.f32 %v1675_v11, %v456_v56  ;;  %v501_v0 = vmul.f32 %v1686_v7, %v456_v56  ;;  %v897_v58 = vmul.f32 %v1578_v21, %v456_v56  ;;  %v898_v61 = vmul.f32 %v1581_v22, %v456_v56 }
  0xa9   : > { %v460_v62 = vpop.permute.xlu1 %459  ;;  %v529_v47 = vmax.f32 %v513_v52, 0.0  ;;  %v528_v1 = vmax.f32 %v512_v53, 0.0  ;;  %v926_v13 = vmax.f32 %v910_v43, 0.0  ;;  %v925_v35 = vmax.f32 %v909_v51, 0.0 }
  0xaa   : > { %v913_v48 = vadd.f32 %v897_v58, %v863_v28  ;;  %v502_v12 = vmul.f32 %v1675_v11, %v460_v62  ;;  %v503_v14 = vmul.f32 %v1686_v7, %v460_v62  ;;  %v899_v15 = vmul.f32 %v1578_v21, %v460_v62 }
  0xab   : > { %v900_v16 = vmul.f32 %v1581_v22, %v460_v62  ;;  %v1254_v17 = vpack.c.bf16 %v531_v57, %v529_v47  ;;  %v1256_v19 = vpack.c.bf16 %v530_v59, %v528_v1  ;;  %v464_v24 = vpop.permute.xlu0 %463  ;;  %v517_v26 = vadd.f32 %v501_v0, %v435_v55 }
  0xac   : > { %v915_v32 = vadd.f32 %v899_v15, %v865_v49  ;;  %v901_v28 = vmul.f32 %v1578_v21, %v464_v24  ;;  %v902_v36 = vmul.f32 %v1581_v22, %v464_v24  ;;  %v519_v37 = vadd.f32 %v503_v14, %v437_v60 }
  0xad   : > { %1255 = vmatprep.subr.bf16.mxu0 %v1254_v17  ;;  %v516_v39 = vadd.f32 %v500_v63, %v434_v30  ;;  %v518_v40 = vadd.f32 %v502_v12, %v436_v31  ;;  %v1727_v41 = vpack.c.bf16 %v928_v34, %v926_v13  ;;  %v533_v8 = vmax.f32 %v517_v26, 0.0 }
  0xae   : > { %1257 = vmatpush1.bf16.msra.mxu0 %v1256_v19  ;;  %v378_v38 = vpop.permute.xlu1 %377  ;;  %v931_v45 = vmax.f32 %v915_v32, 0.0  ;;  %v535_v46 = vmax.f32 %v519_v37, 0.0  ;;  %v929_v52 = vmax.f32 %v913_v48, 0.0  ;;  %v1732_v53 = vpack.c.bf16 %v927_v44, %v925_v35 }
  0xaf   : > { %v851_v27 = vmul.f32 %v1569_v18, %v378_v38  ;;  %v852_v42 = vmul.f32 %v1575_v20, %v378_v38  ;;  %v532_v49 = vmax.f32 %v516_v39, 0.0  ;;  %v534_v51 = vmax.f32 %v518_v40, 0.0 }
  0xb0   : > { %v1258_v54 = vpack.c.bf16 %v535_v46, %v533_v8  ;;  %v914_v56 = vadd.f32 %v898_v61, %v1706_v29  ;;  %v916_v57 = vadd.f32 %v900_v16, %v866_v50  ;;  %v1735_v0 = vpack.c.bf16 %v931_v45, %v929_v52 }
  0xb1   : > { %v1260_v55 = vpack.c.bf16 %v534_v51, %v532_v49  ;;  %v422_v58 = vmul.f32 %v1663_v2, %v378_v38  ;;  %v423_v62 = vmul.f32 %v1666_v3, %v378_v38  ;;  %v504_v13 = vmul.f32 %v1675_v11, %v464_v24  ;;  %v472_v51 = vpop.permute.xlu0 %471 }
  0xb2   : > { %v337_v43 = vpop.permute.xlu1 %336  ;;  %1259 = vmatprep.subr.bf16.mxu0 %v1258_v54  ;;  %v930_v60 = vmax.f32 %v914_v56, 0.0  ;;  %v932_v63 = vmax.f32 %v916_v57, 0.0  ;;  %v505_v61 = vmul.f32 %v1686_v7, %v464_v24  ;;  %v424_v16 = vmul.f32 %v1663_v2, %v1670_v6 }
  0xb3   : > { %v867_v59 = vadd.f32 %v851_v27, %v337_v43  ;;  %v868_v5 = vadd.f32 %v852_v42, %v337_v43  ;;  %1261 = vmatpush1.bf16.msra.mxu0 %v1260_v55  ;;  %v438_v29 = vadd.f32 %v422_v58, %v337_v43  ;;  %v439_v50 = vadd.f32 %v423_v62, %v337_v43 }
  0xb4   : > { %v1740_v12 = vpack.c.bf16 %v932_v63, %v930_v60  ;;  %v425_v17 = vmul.f32 %v1666_v3, %v1670_v6  ;;  %v905_v57 = vmul.f32 %v1578_v21, %v472_v51 }
  0xb5   : > { %v917_v47 = vadd.f32 %v901_v28, %v867_v59  ;;  %v918_v1 = vadd.f32 %v902_v36, %v868_v5  ;;  %v521_v31 = vadd.f32 %v505_v61, %v439_v50  ;;  %v520_v32 = vadd.f32 %v504_v13, %v438_v29 }
  0xb6   : > { %v342_v48 = vpop.permute.xlu1 %341  ;;  %v906_v59 = vmul.f32 %v1581_v22, %v472_v51  ;;  %v428_v29 = vmul.f32 %v1663_v2, %v1694_v23  ;;  %v429_v50 = vmul.f32 %v1666_v3, %v1694_v23  ;;  %v508_v61 = vmul.f32 %v1675_v11, %v472_v51 }
  0xb7   : > { %v869_v14 = vadd.f32 %v1679_v4, %v342_v48  ;;  %v870_v15 = vadd.f32 %v1683_v10, %v342_v48  ;;  %v440_v19 = vadd.f32 %v424_v16, %v342_v48  ;;  %v441_v26 = vadd.f32 %v425_v17, %v342_v48 }
  0xb8   : > { %v933_v38 = vmax.f32 %v917_v47, 0.0  ;;  %v537_v39 = vmax.f32 %v521_v31, 0.0  ;;  %v536_v6 = vmax.f32 %v520_v32, 0.0  ;;  %v934_v40 = vmax.f32 %v918_v1, 0.0 }
  0xbb   : > { %v468_v30 = vpop.permute.xlu1 %467 }
  0xbc   : > { %v506_v34 = vmul.f32 %v1675_v11, %v468_v30  ;;  %v507_v35 = vmul.f32 %v1686_v7, %v468_v30  ;;  %v903_v24 = vmul.f32 %v1578_v21, %v468_v30  ;;  %v904_v4 = vmul.f32 %v1581_v22, %v468_v30 }
  0xbe   : > { %v919_v10 = vadd.f32 %v903_v24, %v869_v14  ;;  %v523_v28 = vadd.f32 %v507_v35, %v441_v26  ;;  %v522_v36 = vadd.f32 %v506_v34, %v440_v19  ;;  %v920_v37 = vadd.f32 %v904_v4, %v870_v15 }
  0xbf   : > { %v509_v14 = vmul.f32 %v1686_v7, %v472_v51  ;;  %v1845_v51 = vpop.permute.xlu0 %551 }
  0xc0   : > { %v935_v44 = vmax.f32 %v919_v10, 0.0  ;;  %v388_v27 = vpop.permute.xlu1 %387  ;;  %v539_v42 = vmax.f32 %v523_v28, 0.0  ;;  %v538_v8 = vmax.f32 %v522_v36, 0.0  ;;  %v936_v45 = vmax.f32 %v920_v37, 0.0 }
  0xc1   : > { %v855_v46 = vmul.f32 %v1569_v18, %v388_v27  ;;  %v856_v49 = vmul.f32 %v1575_v20, %v388_v27  ;;  %v426_v18 = vmul.f32 %v1663_v2, %v388_v27  ;;  %v427_v20 = vmul.f32 %v1666_v3, %v388_v27  ;;  %v1822_v27 = vld [vmem:[%s1997_s3 + $0x28] sm:$0xff] }
  0xc2   : > { %v1262_v52 = vpack.c.bf16 %v539_v42, %v537_v39  ;;  %v1264_v43 = vpack.c.bf16 %v538_v8, %v536_v6  ;;  %v1755_v54 = vpack.c.bf16 %v936_v45, %v934_v40  ;;  %v1757_v55 = vpack.c.bf16 %v935_v44, %v933_v38  ;;  %v1798_v6 = vld [vmem:[%s1997_s3 + $0x10] sm:$0xff]  ;;  %v1806_v40 = vld [vmem:[%s1997_s3 + $0x18] sm:$0xff]  ;;  %v1814_v44 = vld [vmem:[%s1997_s3 + $0x20] sm:$0xff] }
  0xc3   : > { %v1830_v42 = vld [vmem:[%s1997_s3 + $0x30] sm:$0xff]  ;;  %v1838_v8 = vld [vmem:[%s1997_s3 + $0x38] sm:$0xff] }
  0xc4   : > { %v347_v56 = vpop.permute.xlu1 %346  ;;  %1263 = vmatprep.subr.bf16.mxu0 %v1262_v52 }
  0xc5   : > { %v871_v5 = vadd.f32 %v855_v46, %v347_v56  ;;  %v872_v60 = vadd.f32 %v856_v49, %v347_v56  ;;  %1265 = vmatpush1.bf16.msra.mxu0 %v1264_v43  ;;  %v442_v47 = vadd.f32 %v426_v18, %v347_v56  ;;  %v443_v1 = vadd.f32 %v427_v20, %v347_v56 }
  0xc7   : > { %v921_v63 = vadd.f32 %v905_v57, %v871_v5  ;;  %v922_v58 = vadd.f32 %v906_v59, %v872_v60  ;;  %v525_v19 = vadd.f32 %v509_v14, %v443_v1  ;;  %v524_v26 = vadd.f32 %v508_v61, %v442_v47 }
  0xc8   : > { %v352_v62 = vpop.permute.xlu1 %351 }
  0xc9   : > { %v873_v13 = vadd.f32 %v1699_v9, %v352_v62  ;;  %v874_v48 = vadd.f32 %v1703_v25, %v352_v62  ;;  %v444_v15 = vadd.f32 %v428_v29, %v352_v62  ;;  %v445_v16 = vadd.f32 %v429_v50, %v352_v62 }
  0xca   : > { %v937_v34 = vmax.f32 %v921_v63, 0.0  ;;  %v541_v35 = vmax.f32 %v525_v19, 0.0  ;;  %v540_v24 = vmax.f32 %v524_v26, 0.0  ;;  %v938_v4 = vmax.f32 %v922_v58, 0.0 }
  0xcd   : > { %v476_v17 = vpop.permute.xlu1 %475 }
  0xce   : > { %v510_v30 = vmul.f32 %v1675_v11, %v476_v17  ;;  %v511_v9 = vmul.f32 %v1686_v7, %v476_v17  ;;  %v907_v25 = vmul.f32 %v1578_v21, %v476_v17  ;;  %v908_v2 = vmul.f32 %v1581_v22, %v476_v17  ;;  %v1782_v21 = vld [vmem:[%s1997_s3] sm:$0xff]  ;;  %v1790_v22 = vld [vmem:[%s1997_s3 + $0x8] sm:$0xff] }
  0xd0   : > { %v923_v31 = vadd.f32 %v907_v25, %v873_v13  ;;  %v527_v32 = vadd.f32 %v511_v9, %v445_v16  ;;  %v526_v3 = vadd.f32 %v510_v30, %v444_v15  ;;  %v924_v23 = vadd.f32 %v908_v2, %v874_v48 }
  0xd2   : > { %v939_v10 = vmax.f32 %v923_v31, 0.0  ;;  %v543_v28 = vmax.f32 %v527_v32, 0.0  ;;  %v542_v36 = vmax.f32 %v526_v3, 0.0  ;;  %v940_v37 = vmax.f32 %v924_v23, 0.0  ;;  %v1843_v45 = vpop.permute.xlu1 %546  ;;  %v1859_v31 = vpop.permute.xlu0 %566 }
  0xd4   : > { %v1266_v38 = vpack.c.bf16 %v543_v28, %v541_v35  ;;  %v1268_v11 = vpack.c.bf16 %v542_v36, %v540_v24  ;;  %v1775_v39 = vpack.c.bf16 %v940_v37, %v938_v4  ;;  %v1777_v7 = vpack.c.bf16 %v939_v10, %v937_v34 }
  0xd6   : > { %1267 = vmatprep.subr.bf16.mxu0 %v1266_v38  ;;  %v1850_v5 = vpop.permute.xlu1 %556 }
  0xd7   : > { %1269 = vmatpush1.bf16.msra.mxu0 %v1268_v11 }
  0xda   : > { %1228 = vmatmul.mubr.msk.f32.vlgmr.msra.gmra.mrb[0].mxu0 %vm584_vm0, %v1782_v21  ;;  %v1854_v29 = vpop.permute.xlu1 %561 }
  0xdb   : > { %679 = vmatprep.mubr.f32.mxu0 %v1438_v33 }
  0xde   : > { %1229 = vmatmul.mubr.msk.f32.gmra.mrb[2].mxu0 %vm584_vm0, %v1790_v22  ;;  %v1862_v23 = vpop.permute.xlu1 %571 }
  0xdf   : > { %685 = vmatprep.mubr.f32.mxu0 %v1438_v33 }
  0xe2   : > { %1230 = vmatmul.mubr.msk.f32.gmra.mrb[4].mxu0 %vm584_vm0, %v1798_v6 }
  0xe3   : > { %691 = vmatprep.mubr.f32.mxu0 %v1438_v33 }
  0xe6   : > { %1231 = vmatmul.mubr.msk.f32.gmra.mrb[6].mxu0 %vm584_vm0, %v1806_v40 }
  0xe7   : > { %697 = vmatprep.mubr.f32.mxu0 %v1438_v33 }
  0xea   : > { %1232 = vmatmul.mubr.msk.f32.gmra.mrb[8].mxu0 %vm584_vm0, %v1814_v44 }
  0xeb   : > { %703 = vmatprep.mubr.f32.mxu0 %v1438_v33 }
  0xee   : > { %1233 = vmatmul.mubr.msk.f32.gmra.mrb[10].mxu0 %vm584_vm0, %v1822_v27 }
  0xef   : > { %709 = vmatprep.mubr.f32.mxu0 %v1438_v33 }
  0xf2   : > { %1234 = vmatmul.mubr.msk.f32.gmra.mrb[12].mxu0 %vm584_vm0, %v1830_v42 }
  0xf3   : > { %715 = vmatprep.mubr.f32.mxu0 %v1438_v33 }
  0xf6   : > { %1235 = vmatmul.mubr.msk.f32.gmra.mrb[14].mxu0 %vm584_vm0, %v1838_v8 }
  0xf7   : > { %1134 = vmatprep.mubr.f32.mxu0 %v1438_v33 }
 0x1ad   : > { %v675_v46 = vpop.f32.mrb[0].mxu0 }
 0x1ae   : > { %v677_v49 = vpop.f32.mrb[1].mxu0  ;;  %v676_v52 = vadd.f32 %v675_v46, %v1843_v45 }
 0x1af   : > { %v678_v43 = vadd.f32 %v677_v49, %v1843_v45 }
 0x1b0   : > { %v722_v18 = vmax.f32 %v676_v52, 0.0  ;;  %v1867_v52 = vpop.permute.xlu0 %576 }
 0x1b1   : > { %v681_v56 = vpop.f32.mrb[2].mxu0  ;;  %v723_v63 = vmax.f32 %v678_v43, 0.0 }
 0x1b2   : > { %v682_v57 = vadd.f32 %v681_v56, %v1845_v51  ;;  %v683_v59 = vpop.f32.mrb[3].mxu0 }
 0x1b3   : > { %v684_v60 = vadd.f32 %v683_v59, %v1845_v51 }
 0x1b4   : > { %v724_v20 = vmax.f32 %v682_v57, 0.0  ;;  %v1870_v57 = vpop.permute.xlu1 %581 }
 0x1b5   : > { %v725_v58 = vmax.f32 %v684_v60, 0.0  ;;  %v687_v62 = vpop.f32.mrb[4].mxu0 }
 0x1b6   : > { %v689_v47 = vpop.f32.mrb[5].mxu0  ;;  %v1272_v1 = vpack.c.bf16 %v724_v20, %v722_v18  ;;  %v688_v48 = vadd.f32 %v687_v62, %v1850_v5 }
 0x1b7   : > { %v1270_v13 = vpack.c.bf16 %v725_v58, %v723_v63  ;;  %v690_v50 = vadd.f32 %v689_v47, %v1850_v5 }
 0x1b8   : > { %v726_v17 = vmax.f32 %v688_v48, 0.0 }
 0x1b9   : > { %v693_v61 = vpop.f32.mrb[6].mxu0  ;;  %1271 = vmatprep.subr.bf16.mxu1 %v1270_v13  ;;  %v727_v26 = vmax.f32 %v690_v50, 0.0  ;;  %v1878_v50 = vld [vmem:[%s1999_s5] sm:$0x7] }
 0x1ba   : > { %v694_v14 = vadd.f32 %v693_v61, %v1854_v29  ;;  %v695_v15 = vpop.f32.mrb[7].mxu0  ;;  %1273 = vmatpush1.bf16.msra.mxu1 %v1272_v1 }
 0x1bb   : > { %v696_v16 = vadd.f32 %v695_v15, %v1854_v29 }
 0x1bc   : > { %v728_v19 = vmax.f32 %v694_v14, 0.0 }
 0x1bd   : > { %v729_v30 = vmax.f32 %v696_v16, 0.0  ;;  %v699_v9 = vpop.f32.mrb[8].mxu0 }
 0x1be   : > { %v1276_v25 = vpack.c.bf16 %v728_v19, %v726_v17  ;;  %v701_v2 = vpop.f32.mrb[9].mxu0  ;;  %v700_v3 = vadd.f32 %v699_v9, %v1859_v31 }
 0x1bf   : > { %v1274_v32 = vpack.c.bf16 %v729_v30, %v727_v26  ;;  %v702_v34 = vadd.f32 %v701_v2, %v1859_v31 }
 0x1c0   : > { %v730_v28 = vmax.f32 %v700_v3, 0.0 }
 0x1c1   : > { %v705_v35 = vpop.f32.mrb[10].mxu0  ;;  %1275 = vmatprep.subr.bf16.mxu1 %v1274_v32  ;;  %v731_v37 = vmax.f32 %v702_v34, 0.0 }
 0x1c2   : > { %v706_v24 = vadd.f32 %v705_v35, %v1862_v23  ;;  %v707_v4 = vpop.f32.mrb[11].mxu0  ;;  %1277 = vmatpush1.bf16.msra.mxu1 %v1276_v25 }
 0x1c3   : > { %v708_v10 = vadd.f32 %v707_v4, %v1862_v23 }
 0x1c4   : > { %v732_v36 = vmax.f32 %v706_v24, 0.0 }
 0x1c5   : > { %v733_v38 = vmax.f32 %v708_v10, 0.0  ;;  %v711_v11 = vpop.f32.mrb[12].mxu0 }
 0x1c6   : > { %v1280_v46 = vpack.c.bf16 %v732_v36, %v730_v28  ;;  %v713_v49 = vpop.f32.mrb[13].mxu0  ;;  %v712_v56 = vadd.f32 %v711_v11, %v1867_v52 }
 0x1c7   : > { %v1278_v43 = vpack.c.bf16 %v733_v38, %v731_v37  ;;  %v714_v59 = vadd.f32 %v713_v49, %v1867_v52 }
 0x1c8   : > { %v734_v58 = vmax.f32 %v712_v56, 0.0 }
 0x1c9   : > { %v717_v60 = vpop.f32.mrb[14].mxu0  ;;  %1279 = vmatprep.subr.bf16.mxu1 %v1278_v43  ;;  %v735_v47 = vmax.f32 %v714_v59, 0.0 }
 0x1ca   : > { %v718_v18 = vadd.f32 %v717_v60, %v1870_v57  ;;  %v719_v20 = vpop.f32.mrb[15].mxu0  ;;  %1281 = vmatpush1.bf16.msra.mxu1 %v1280_v46 }
 0x1cb   : > { %v720_v63 = vadd.f32 %v719_v20, %v1870_v57 }
 0x1cc   : > { %v736_v62 = vmax.f32 %v718_v18, 0.0 }
 0x1cd   : > { %v737_v1 = vmax.f32 %v720_v63, 0.0 }
 0x1ce   : > { %v1284_v13 = vpack.c.bf16 %v736_v62, %v734_v58 }
 0x1cf   : > { %v1282_v48 = vpack.c.bf16 %v737_v1, %v735_v47 }
 0x1d1   : > { %1283 = vmatprep.subr.bf16.mxu1 %v1282_v48 }
 0x1d2   : > { %1285 = vmatpush1.bf16.msra.mxu1 %v1284_v13 }
 0x1d3   : > { %1287 = vmatprep.subr.bf16.mxu1 %v1727_v41  ;;  %v1915_v41 = vpop.permute.xlu0 %740 }
 0x1d5   : > { %1236 = vmatmul.mubr.msk.f32.vlgmr.msra.gmra.mrb[0].mxu1 %vm584_vm0, %v1878_v50 }
 0x1d6   : > { %1289 = vmatpush1.bf16.msra.mxu1 %v1732_v53  ;;  %1005 = vmatprep.mubr.f32.mxu1 %v1438_v33 }
 0x1d7   : > { %1291 = vmatprep.subr.bf16.mxu1 %v1740_v12 }
 0x1da   : > { %1293 = vmatpush1.bf16.msra.mxu1 %v1735_v0 }
 0x1db   : > { %1295 = vmatprep.subr.bf16.mxu1 %v1755_v54 }
 0x1de   : > { %1297 = vmatpush1.bf16.msra.mxu1 %v1757_v55 }
 0x1df   : > { %1299 = vmatprep.subr.bf16.mxu1 %v1775_v39 }
 0x1e2   : > { %1301 = vmatpush1.bf16.msra.mxu1 %v1777_v7 }
 0x1e5   : > { %1238 = vmatmul.mubr.msk.f32.vlgmr.msra.gmra.mrb[2].mxu1 %vm584_vm0, %v1782_v21 }
 0x1e6   : > { %1011 = vmatprep.mubr.f32.mxu1 %v1438_v33 }
 0x1e9   : > { %1239 = vmatmul.mubr.msk.f32.gmra.mrb[4].mxu1 %vm584_vm0, %v1790_v22 }
 0x1ea   : > { %1017 = vmatprep.mubr.f32.mxu1 %v1438_v33 }
 0x1ed   : > { %1240 = vmatmul.mubr.msk.f32.gmra.mrb[6].mxu1 %vm584_vm0, %v1798_v6 }
 0x1ee   : > { %1023 = vmatprep.mubr.f32.mxu1 %v1438_v33 }
 0x1f1   : > { %1241 = vmatmul.mubr.msk.f32.gmra.mrb[8].mxu1 %vm584_vm0, %v1806_v40 }
 0x1f2   : > { %1029 = vmatprep.mubr.f32.mxu1 %v1438_v33 }
 0x1f5   : > { %1242 = vmatmul.mubr.msk.f32.gmra.mrb[10].mxu1 %vm584_vm0, %v1814_v44 }
 0x1f6   : > { %1035 = vmatprep.mubr.f32.mxu1 %v1438_v33 }
 0x1f9   : > { %1243 = vmatmul.mubr.msk.f32.gmra.mrb[12].mxu1 %vm584_vm0, %v1822_v27 }
 0x1fa   : > { %1041 = vmatprep.mubr.f32.mxu1 %v1438_v33 }
 0x1fd   : > { %1244 = vmatmul.mubr.msk.f32.gmra.mrb[14].mxu1 %vm584_vm0, %v1830_v42 }
 0x1fe   : > { %1047 = vmatprep.mubr.f32.mxu1 %v1438_v33 }
 0x201   : > { %1245 = vmatmul.mubr.msk.f32.gmra.mrb[16].mxu1 %vm584_vm0, %v1838_v8 }
 0x2a8   : > { %v812_v53 = vpop.f32.mrb[0].mxu1 }
 0x2a9   : > { %v813_v0 = vadd.f32 %v812_v53, %v1915_v41  ;;  %v814_v12 = vpop.f32.mrb[1].mxu1 }
 0x2aa   : > { %v815_v54 = vadd.f32 %v814_v12, %v1915_v41 }
 0x2ac   : > { %v819_v55 = vcombine.low %v813_v0, %v815_v54 }
 0x2ae   : > { %821 = vst [vmem:[%s1921_s20] sm:$0x77] %v819_v55 }
 0x2b8   : > { %v1007_v33 = vpop.f32.mrb[2].mxu1 }
 0x2b9   : > { %v1009_v39 = vpop.f32.mrb[3].mxu1  ;;  %v1008_v7 = vadd.f32 %v1007_v33, %v1843_v45 }
 0x2ba   : > { %v1010_v21 = vadd.f32 %v1009_v39, %v1843_v45 }
 0x2bb   : > { %v1054_v27 = vmax.f32 %v1008_v7, 0.0 }
 0x2bc   : > { %v1013_v22 = vpop.f32.mrb[4].mxu1  ;;  %v1055_v8 = vmax.f32 %v1010_v21, 0.0 }
 0x2bd   : > { %v1014_v6 = vadd.f32 %v1013_v22, %v1845_v51  ;;  %v1015_v40 = vpop.f32.mrb[5].mxu1 }
 0x2be   : > { %v1016_v44 = vadd.f32 %v1015_v40, %v1845_v51 }
 0x2bf   : > { %v1056_v42 = vmax.f32 %v1014_v6, 0.0 }
 0x2c0   : > { %v1057_v61 = vmax.f32 %v1016_v44, 0.0  ;;  %v1019_v14 = vpop.f32.mrb[6].mxu1 }
 0x2c1   : > { %v1304_v15 = vpack.c.bf16 %v1056_v42, %v1054_v27  ;;  %v1021_v16 = vpop.f32.mrb[7].mxu1  ;;  %v1020_v19 = vadd.f32 %v1019_v14, %v1850_v5 }
 0x2c2   : > { %v1302_v17 = vpack.c.bf16 %v1057_v61, %v1055_v8  ;;  %v1022_v26 = vadd.f32 %v1021_v16, %v1850_v5 }
 0x2c3   : > { %v1058_v25 = vmax.f32 %v1020_v19, 0.0 }
 0x2c4   : > { %v1025_v30 = vpop.f32.mrb[8].mxu1  ;;  %1303 = vmatprep.subr.bf16.mxu0 %v1302_v17  ;;  %v1059_v32 = vmax.f32 %v1022_v26, 0.0 }
 0x2c5   : > { %v1026_v45 = vadd.f32 %v1025_v30, %v1854_v29  ;;  %v1027_v9 = vpop.f32.mrb[9].mxu1  ;;  %1305 = vmatpush1.bf16.msra.mxu0 %v1304_v15 }
 0x2c6   : > { %v1028_v51 = vadd.f32 %v1027_v9, %v1854_v29 }
 0x2c7   : > { %v1060_v2 = vmax.f32 %v1026_v45, 0.0 }
 0x2c8   : > { %v1061_v3 = vmax.f32 %v1028_v51, 0.0  ;;  %v1031_v34 = vpop.f32.mrb[10].mxu1 }
 0x2c9   : > { %v1308_v35 = vpack.c.bf16 %v1060_v2, %v1058_v25  ;;  %v1033_v24 = vpop.f32.mrb[11].mxu1  ;;  %v1032_v10 = vadd.f32 %v1031_v34, %v1859_v31 }
 0x2ca   : > { %v1306_v4 = vpack.c.bf16 %v1061_v3, %v1059_v32  ;;  %v1034_v5 = vadd.f32 %v1033_v24, %v1859_v31 }
 0x2cb   : > { %v1062_v38 = vmax.f32 %v1032_v10, 0.0 }
 0x2cc   : > { %v1037_v28 = vpop.f32.mrb[12].mxu1  ;;  %1307 = vmatprep.subr.bf16.mxu0 %v1306_v4  ;;  %v1063_v46 = vmax.f32 %v1034_v5, 0.0 }
 0x2cd   : > { %v1038_v36 = vadd.f32 %v1037_v28, %v1862_v23  ;;  %v1039_v37 = vpop.f32.mrb[13].mxu1  ;;  %1309 = vmatpush1.bf16.msra.mxu0 %v1308_v35 }
 0x2ce   : > { %v1040_v29 = vadd.f32 %v1039_v37, %v1862_v23 }
 0x2cf   : > { %v1064_v11 = vmax.f32 %v1038_v36, 0.0 }
 0x2d0   : > { %v1065_v49 = vmax.f32 %v1040_v29, 0.0  ;;  %v1043_v43 = vpop.f32.mrb[14].mxu1 }
 0x2d1   : > { %v1312_v56 = vpack.c.bf16 %v1064_v11, %v1062_v38  ;;  %v1045_v59 = vpop.f32.mrb[15].mxu1  ;;  %v1044_v18 = vadd.f32 %v1043_v43, %v1867_v52 }
 0x2d2   : > { %v1310_v60 = vpack.c.bf16 %v1065_v49, %v1063_v46  ;;  %v1046_v31 = vadd.f32 %v1045_v59, %v1867_v52 }
 0x2d3   : > { %v1066_v62 = vmax.f32 %v1044_v18, 0.0 }
 0x2d4   : > { %v1049_v20 = vpop.f32.mrb[16].mxu1  ;;  %1311 = vmatprep.subr.bf16.mxu0 %v1310_v60  ;;  %v1067_v1 = vmax.f32 %v1046_v31, 0.0 }
 0x2d5   : > { %v1050_v63 = vadd.f32 %v1049_v20, %v1870_v57  ;;  %v1051_v58 = vpop.f32.mrb[17].mxu1  ;;  %1313 = vmatpush1.bf16.msra.mxu0 %v1312_v56 }
 0x2d6   : > { %v1052_v23 = vadd.f32 %v1051_v58, %v1870_v57 }
 0x2d7   : > { %v1068_v47 = vmax.f32 %v1050_v63, 0.0 }
 0x2d8   : > { %v1069_v13 = vmax.f32 %v1052_v23, 0.0 }
 0x2d9   : > { %v1316_v48 = vpack.c.bf16 %v1068_v47, %v1066_v62 }
 0x2da   : > { %v1314_v53 = vpack.c.bf16 %v1069_v13, %v1067_v1 }
 0x2dc   : > { %1315 = vmatprep.subr.bf16.mxu0 %v1314_v53 }
 0x2dd   : > { %1317 = vmatpush1.bf16.msra.mxu0 %v1316_v48 }
 0x2e0   : > { %1246 = vmatmul.mubr.msk.f32.vlgmr.msra.gmra.mrb[16].mxu0 %vm584_vm0, %v1878_v50 }
 0x3b3   : > { %v1136_v52 = vpop.f32.mrb[16].mxu0 }
 0x3b4   : > { %v1137_v0 = vadd.f32 %v1136_v52, %v1915_v41  ;;  %v1138_v12 = vpop.f32.mrb[17].mxu0 }
 0x3b5   : > { %v1139_v57 = vadd.f32 %v1138_v12, %v1915_v41 }
 0x3b7   : > { %v1143_v54 = vcombine.low %v1137_v0, %v1139_v57 }
 0x3b9   : > { %1247 = vst [vmem:[%s1921_s20 + $0x8] sm:$0x77] %v1143_v54 }
 0x3ba   : > { %1385 = shalt.err (!%p1382_p3)
}
 0x3bb   : > { %s1386_s16 = scalar_lea.hbm %s1949_s9, 256  ;;  %s1390_s19 = scalar_lea.hbm %s2001_s7, 1024 }
 0x3bc   : > { %p1387_p4 = scmp.ne.s32.totalorder %s1949_s9, %s1386_s16  ;;  %p1391_p9 = scmp.lt.u32.totalorder %s1949_s9, %s2001_s7 }
 0x3bd   : > { %p1392_p10 = scmp.lt.u32.totalorder %s1390_s19, %s1386_s16  ;;  %p1394_p12 = scmp.lt.u32.totalorder %s1386_s16, %s1949_s9 }
 0x3be   : > { %p1388_p7 = pnand %p1387_p4, %p1518_p5 }
 0x3bf   : > { %p1393_p11 = por %p1392_p10, %p1391_p9 }
 0x3c0   : > { %p1389_p8 = pneg %p1388_p7 }
 0x3c1   : > { %p1395_p13 = por %p1394_p12, %p1393_p11 }
 0x3c3   : > { %p1396_p0 = pnand %p1395_p13, %p1389_p8 }
 0x3c5   : > { %1399 = shalt.err (!%p1396_p0)
}
 0x3c6   : > { %1318 = dma.vmem_to_hbm [thread:$0]  (%p1518_p5), %s1951_s22, 256, %s1949_s9, %s1148_s13  }
 0x3c7 PF: > { %p1324_p1 = scmp.ge.s32.totalorder %s1434_s27, 2  ;;  %s1174_s23 = sand.u32 1, %s1422_s24  }
 0x3c8   : > { %s1175_s29 = scalar_lea.sflag [#allocation3], %s1174_s23 }
 0x3c9   : > { %p1321_p2 = pnand %p1324_p1, %p1522_p6 }
 0x3cb   : > { %1417 = dma.done.wait (!%p1321_p2), %s1175_s29, 256  }
 0x3cc   : > { %1419 = vsyncadd (!%p1321_p2), %s1175_s29, 4294967040  ;;  %p17_p3 = scmp.ge.s32.totalorder %s1505_s30, 6   ;;  %s2004_s24 = smov %s1426_s25 }
 0x3cd   : > { %s2005_s25 = smov %s1430_s26  ;;  %s2006_s26 = smov %s1516_s10 }
 0x3ce   : > { %s2007_s27 = smov %s1505_s30  ;;  %19 = sbr.rel (!%p17_p3) target bundleno = 3 (0x3), region = 85 }
 0x3d5   :  { %1180 = vsyncpa [#allocation3], 1 }
 0x3d6   :  { %1182 = vsyncpa [#allocation3 + $0x1], 1 }

</bundles_post_ra>
